<compile_context>
chip_gen: v6e
topology: v6e:2x2x1
jax: 0.10.0
libtpu: 0.0.40
codegen_flags: <defaults>
</compile_context>

<pallas_src>
import functools

import jax
import jax.numpy as jnp
from jax import lax
from jax.experimental import pallas as pl
from jax.experimental.pallas import tpu as pltpu

NEG_SLOPE = 0.01   # torch.nn.LeakyReLU default
BN_EPS = 1e-5      # torch.nn.BatchNorm2d default


# ----------------------------------------------------------------------------
# tile pickers
# ----------------------------------------------------------------------------

def _pick_row_tile(ho, wo, cout, budget_bytes=2 << 20):
    """Largest th dividing Ho with a ~2MB f32 output tile and (th*Wo) % 8 == 0 (or th == Ho)."""
    cap = max(1, budget_bytes // max(1, wo * cout * 4))
    for th in range(min(ho, cap), 0, -1):
        if ho % th == 0 and ((th * wo) % 8 == 0 or th == ho):
            return th
    return ho


def _pick_rows_tile(m, cap=2048):
    """Largest row tile <= cap that divides m (prefers multiples of 8)."""
    if m <= cap:
        return m
    t = (cap // 8) * 8
    while t >= 8:
        if m % t == 0:
            return t
        t -= 8
    return m


# ----------------------------------------------------------------------------
# Kernel 1: strided conv (4 tap-matmuls) + bias + LeakyReLU + fused BN stats
# ----------------------------------------------------------------------------

def _conv_lrelu_stats_kernel(xs_ref, w_ref, b_ref, y_ref, sum_ref, sq_ref, *, th, wo):
    # xs_ref : (1, Hp, Wp, K)    bf16 padded space-to-depth slab for batch b
    #                            (block index depends only on b -> DMA'd once per b)
    # w_ref  : (4, K, Cout)      bf16 tap weights, t = 2*u + v
    # b_ref  : (1, Cout)         f32 bias
    # y_ref  : (1, th*Wo, Cout)  f32 LeakyReLU output tile (pre-BN)
    # sum_ref, sq_ref : (1, 1, Cout) f32 per-batch-element channel stats
    #                            (resident accumulators across the row-tile axis)
    i = pl.program_id(1)
    k = w_ref.shape[1]
    cout = w_ref.shape[2]
    row0 = i * th

    acc = jnp.zeros((th * wo, cout), jnp.float32)
    for u in range(2):
        for v in range(2):
            # out[i, j] tap (u, v) reads s2d rows [row0+u, row0+u+th), cols [v, v+Wo)
            tap = xs_ref[0, pl.ds(row0 + u, th), pl.ds(v, wo), :]      # (th, Wo, K) bf16
            acc += jnp.dot(tap.reshape(th * wo, k), w_ref[2 * u + v],
                           preferred_element_type=jnp.float32)
    acc = acc + b_ref[...]                                             # (1, Cout) broadcast
    y = jnp.where(acc >= 0, acc, NEG_SLOPE * acc)                      # LeakyReLU
    y_ref[0] = y

    # fused BatchNorm batch statistics (reduced over the batch axis outside)
    @pl.when(i == 0)
    def _():
        sum_ref[...] = jnp.zeros_like(sum_ref)
        sq_ref[...] = jnp.zeros_like(sq_ref)

    sum_ref[...] += jnp.sum(y, axis=0, keepdims=True).reshape(1, 1, cout)
    sq_ref[...] += jnp.sum(y * y, axis=0, keepdims=True).reshape(1, 1, cout)


def conv_lrelu_stats(xs, w_tap, bias_row, *, n, ho, wo, cout, th):
    hp, wp = ho + 1, wo + 1
    k = w_tap.shape[1]
    kernel = functools.partial(_conv_lrelu_stats_kernel, th=th, wo=wo)
    return pl.pallas_call(
        kernel,
        out_shape=(
            jax.ShapeDtypeStruct((n, ho * wo, cout), jnp.float32),   # pre-BN activation
            jax.ShapeDtypeStruct((n, 1, cout), jnp.float32),         # per-batch channel sum
            jax.ShapeDtypeStruct((n, 1, cout), jnp.float32),         # per-batch channel sum-sq
        ),
        grid=(n, ho // th),
        in_specs=[
            pl.BlockSpec((1, hp, wp, k), lambda b, i: (b, 0, 0, 0)),  # resident per batch element
            pl.BlockSpec((4, k, cout), lambda b, i: (0, 0, 0)),       # resident weights
            pl.BlockSpec((1, cout), lambda b, i: (0, 0)),             # resident bias
        ],
        out_specs=(
            pl.BlockSpec((1, th * wo, cout), lambda b, i: (b, i, 0)),
            pl.BlockSpec((1, 1, cout), lambda b, i: (b, 0, 0)),
            pl.BlockSpec((1, 1, cout), lambda b, i: (b, 0, 0)),
        ),
        compiler_params=pltpu.CompilerParams(
            dimension_semantics=("parallel", "arbitrary")),
    )(xs, w_tap, bias_row)


# ----------------------------------------------------------------------------
# Kernel 2: per-channel affine (BatchNorm normalize with precomputed scale/shift)
# ----------------------------------------------------------------------------

def _bn_apply_kernel(y_ref, scale_ref, shift_ref, o_ref):
    o_ref[...] = y_ref[...] * scale_ref[...] + shift_ref[...]


def bn_apply(y2d, scale_row, shift_row):
    m, c = y2d.shape
    tm = _pick_rows_tile(m)
    return pl.pallas_call(
        _bn_apply_kernel,
        out_shape=jax.ShapeDtypeStruct((m, c), jnp.float32),
        grid=(m // tm,),
        in_specs=[
            pl.BlockSpec((tm, c), lambda i: (i, 0)),
            pl.BlockSpec((1, c), lambda i: (0, 0)),
            pl.BlockSpec((1, c), lambda i: (0, 0)),
        ],
        out_specs=pl.BlockSpec((tm, c), lambda i: (i, 0)),
        compiler_params=pltpu.CompilerParams(dimension_semantics=("parallel",)),
    )(y2d, scale_row, shift_row)


# ----------------------------------------------------------------------------
# Forward: bn(leaky_relu(conv(x)))
# ----------------------------------------------------------------------------

def strided_conv_relu_bn(x, params):
    """x: (N, Cin, H, W) f32  ->  (N, Cout, H/2, W/2) f32 (training-mode BN stats)."""
    w, b = params["w"], params["b"]
    gamma, beta = params["gamma"], params["beta"]
    n, cin, h, wdt = x.shape
    assert h % 2 == 0 and wdt % 2 == 0
    cout = w.shape[0]
    ho, wo = h // 2, wdt // 2
    hp, wp = ho + 1, wo + 1
    k4 = 4 * cin

    # --- layout prep (XLA glue on the raw input only; no patch materialization) ---
    x_nhwc = jnp.transpose(x, (0, 2, 3, 1))
    xp = jnp.pad(x_nhwc, ((0, 0), (1, 1), (1, 1), (0, 0)))
    # space-to-depth: xs[n, p, q, (2r+s)*Cin + ci] = x_pad[n, 2p+r, 2q+s, ci]
    xs = (xp.reshape(n, hp, 2, wp, 2, cin)
            .transpose(0, 1, 3, 2, 4, 5)
            .reshape(n, hp, wp, k4)
            .astype(jnp.bfloat16))
    # tap weights: w_tap[2u+v, (2r+s)*Cin + ci, co] = W[co, ci, 2u+r, 2v+s]
    w_tap = (w.reshape(cout, cin, 2, 2, 2, 2)
               .transpose(2, 4, 3, 5, 1, 0)
               .reshape(4, k4, cout)
               .astype(jnp.bfloat16))
    bias_row = b.reshape(1, cout).astype(jnp.float32)

    th = _pick_row_tile(ho, wo, cout)
    y, s_nc, sq_nc = conv_lrelu_stats(xs, w_tap, bias_row,
                                      n=n, ho=ho, wo=wo, cout=cout, th=th)

    # --- BN batch statistics -> per-channel affine (tiny (C,) math) ---
    # TODO(synk): running_mean / running_var buffers are not tracked (forward-only,
    # training-mode batch statistics as in module.train()).
    cnt = n * ho * wo
    s = jnp.sum(s_nc, axis=(0, 1))
    sq = jnp.sum(sq_nc, axis=(0, 1))
    mean = s / cnt
    var = jnp.maximum(sq / cnt - mean * mean, 0.0)   # clamp: avoid tiny negative variance
    inv_std = lax.rsqrt(var + BN_EPS)
    scale = gamma * inv_std
    shift = beta - mean * scale

    # --- normalize (lane-dense view when Cout divides 128) ---
    total = n * ho * wo * cout
    if cout < 128 and 128 % cout == 0 and total % 128 == 0:
        rep = 128 // cout
        out2d = bn_apply(y.reshape(total // 128, 128),
                         jnp.tile(scale, rep).reshape(1, 128),
                         jnp.tile(shift, rep).reshape(1, 128))
    else:
        out2d = bn_apply(y.reshape(total // cout, cout),
                         scale.reshape(1, cout), shift.reshape(1, cout))
    out = out2d.reshape(n, ho, wo, cout)
    return jnp.transpose(out, (0, 3, 1, 2))          # back to PyTorch NCHW


# ----------------------------------------------------------------------------
# params / reference / test
# ----------------------------------------------------------------------------

def init_params(key, cin, cout):
    # kaiming_normal_(nonlinearity='leaky_relu', a=0) -> std = sqrt(2 / (cin*4*4)); bias = 0.
    std = (2.0 / (cin * 16)) ** 0.5
    w = jax.random.normal(key, (cout, cin, 4, 4), jnp.float32) * std
    return {"w": w,
            "b": jnp.zeros((cout,), jnp.float32),
            "gamma": jnp.ones((cout,), jnp.float32),
            "beta": jnp.zeros((cout,), jnp.float32)}


def _reference(x, params):
    """Pure-JAX reference on bf16-rounded inputs (matches the kernel's MXU precision)."""
    xq = x.astype(jnp.bfloat16).astype(jnp.float32)
    wq = params["w"].astype(jnp.bfloat16).astype(jnp.float32)
    y = lax.conv_general_dilated(
        xq, wq, window_strides=(2, 2), padding=((1, 1), (1, 1)),
        dimension_numbers=("NCHW", "OIHW", "NCHW"),
        precision=lax.Precision.HIGHEST)
    y = y + params["b"].reshape(1, -1, 1, 1)
    y = jnp.where(y >= 0, y, NEG_SLOPE * y)
    mean = jnp.mean(y, axis=(0, 2, 3), keepdims=True)
    var = jnp.mean(jnp.square(y - mean), axis=(0, 2, 3), keepdims=True)
    yhat = (y - mean) * lax.rsqrt(var + BN_EPS)
    return yhat * params["gamma"].reshape(1, -1, 1, 1) + params["beta"].reshape(1, -1, 1, 1)


if __name__ == "__main__":
    key = jax.random.PRNGKey(0)
    kx, kp = jax.random.split(key)
    N, CIN, H, W = 2, 4, 16, 16
    COUT = 16
    x = jax.random.normal(kx, (N, CIN, H, W), jnp.float32)
    params = init_params(kp, CIN, COUT)

    fwd = jax.jit(strided_conv_relu_bn)
    out = fwd(x, params)
    jax.block_until_ready(out)

    assert out.shape == (N, COUT, H // 2, W // 2), out.shape
    assert bool(jnp.isfinite(out).all())

    ref = _reference(x, params)
    err = float(jnp.max(jnp.abs(out - ref)))
    assert err < 2e-2, f"max abs err vs reference = {err}"
    print("KERNEL_OK")
</pallas_src>

<mosaic_0001>
module attributes {stable_mosaic.version = 11 : i64} {
  func.func @_conv_lrelu_stats_kernel(%arg0: i32, %arg1: i32, %arg2: memref<1x9x9x16xbf16, #tpu.memory_space<vmem>>, %arg3: memref<4x16x16xbf16, #tpu.memory_space<vmem>>, %arg4: memref<1x16xf32, #tpu.memory_space<vmem>>, %arg5: memref<1x64x16xf32, #tpu.memory_space<vmem>>, %arg6: memref<1x1x16xf32, #tpu.memory_space<vmem>>, %arg7: memref<1x1x16xf32, #tpu.memory_space<vmem>>) attributes {dimension_semantics = [#tpu.dimension_semantics<parallel>, #tpu.dimension_semantics<arbitrary>], iteration_bounds = array<i64: 2, 1>, scalar_prefetch = 0 : i64, scratch_operands = 0 : i64, tpu.core_type = #tpu.core_type<tc>, window_params = [{transform_indices = @transform_0, window_bounds = array<i64: 1, 9, 9, 16>}, {pipeline_mode = #tpu.pipeline_mode<synchronous>, transform_indices = @transform_1, window_bounds = array<i64: 4, 16, 16>}, {pipeline_mode = #tpu.pipeline_mode<synchronous>, transform_indices = @transform_2, window_bounds = array<i64: 1, 16>}, {transform_indices = @transform_3, window_bounds = array<i64: 1, 64, 16>}, {transform_indices = @transform_4, window_bounds = array<i64: 1, 1, 16>}, {transform_indices = @transform_5, window_bounds = array<i64: 1, 1, 16>}]} {
    %c8_i32 = arith.constant 8 : i32
    %0 = arith.muli %arg1, %c8_i32 : i32
    %cst = arith.constant 0.000000e+00 : f32
    %1 = vector.broadcast %cst : f32 to vector<64x16xf32>
    %c0_i32 = arith.constant 0 : i32
    %2 = arith.addi %0, %c0_i32 : i32
    %c0 = arith.constant 0 : index
    %3 = arith.index_cast %2 : i32 to index
    %c0_0 = arith.constant 0 : index
    %c0_1 = arith.constant 0 : index
    %4 = vector.load %arg2[%c0, %3, %c0_0, %c0_1] : memref<1x9x9x16xbf16, #tpu.memory_space<vmem>>, vector<1x8x8x16xbf16>
    %5 = vector.shape_cast %4 : vector<1x8x8x16xbf16> to vector<8x8x16xbf16>
    %6 = vector.shape_cast %5 : vector<8x8x16xbf16> to vector<64x16xbf16>
    %c0_2 = arith.constant 0 : index
    %c0_3 = arith.constant 0 : index
    %c0_4 = arith.constant 0 : index
    %7 = vector.load %arg3[%c0_2, %c0_3, %c0_4] : memref<4x16x16xbf16, #tpu.memory_space<vmem>>, vector<1x16x16xbf16>
    %8 = vector.shape_cast %7 : vector<1x16x16xbf16> to vector<16x16xbf16>
    %cst_5 = arith.constant dense<0.000000e+00> : vector<64x16xf32>
    %9 = tpu.matmul %6, %8, %cst_5 {dimension_numbers = #tpu.dot_dimension_numbers<[1], [0], [0], [1], [0, 0, 1, 1], [], []>} : vector<64x16xbf16>, vector<16x16xbf16>, vector<64x16xf32> -> vector<64x16xf32>
    %10 = arith.addf %1, %9 : vector<64x16xf32>
    %c0_i32_6 = arith.constant 0 : i32
    %11 = arith.addi %0, %c0_i32_6 : i32
    %c0_7 = arith.constant 0 : index
    %12 = arith.index_cast %11 : i32 to index
    %c1 = arith.constant 1 : index
    %c0_8 = arith.constant 0 : index
    %13 = vector.load %arg2[%c0_7, %12, %c1, %c0_8] : memref<1x9x9x16xbf16, #tpu.memory_space<vmem>>, vector<1x8x8x16xbf16>
    %14 = vector.shape_cast %13 : vector<1x8x8x16xbf16> to vector<8x8x16xbf16>
    %15 = vector.shape_cast %14 : vector<8x8x16xbf16> to vector<64x16xbf16>
    %c1_9 = arith.constant 1 : index
    %c0_10 = arith.constant 0 : index
    %c0_11 = arith.constant 0 : index
    %16 = vector.load %arg3[%c1_9, %c0_10, %c0_11] : memref<4x16x16xbf16, #tpu.memory_space<vmem>>, vector<1x16x16xbf16>
    %17 = vector.shape_cast %16 : vector<1x16x16xbf16> to vector<16x16xbf16>
    %cst_12 = arith.constant dense<0.000000e+00> : vector<64x16xf32>
    %18 = tpu.matmul %15, %17, %cst_12 {dimension_numbers = #tpu.dot_dimension_numbers<[1], [0], [0], [1], [0, 0, 1, 1], [], []>} : vector<64x16xbf16>, vector<16x16xbf16>, vector<64x16xf32> -> vector<64x16xf32>
    %19 = arith.addf %10, %18 : vector<64x16xf32>
    %c1_i32 = arith.constant 1 : i32
    %20 = arith.addi %0, %c1_i32 : i32
    %c0_13 = arith.constant 0 : index
    %21 = arith.index_cast %20 : i32 to index
    %c0_14 = arith.constant 0 : index
    %c0_15 = arith.constant 0 : index
    %22 = vector.load %arg2[%c0_13, %21, %c0_14, %c0_15] : memref<1x9x9x16xbf16, #tpu.memory_space<vmem>>, vector<1x8x8x16xbf16>
    %23 = vector.shape_cast %22 : vector<1x8x8x16xbf16> to vector<8x8x16xbf16>
    %24 = vector.shape_cast %23 : vector<8x8x16xbf16> to vector<64x16xbf16>
    %c2 = arith.constant 2 : index
    %c0_16 = arith.constant 0 : index
    %c0_17 = arith.constant 0 : index
    %25 = vector.load %arg3[%c2, %c0_16, %c0_17] : memref<4x16x16xbf16, #tpu.memory_space<vmem>>, vector<1x16x16xbf16>
    %26 = vector.shape_cast %25 : vector<1x16x16xbf16> to vector<16x16xbf16>
    %cst_18 = arith.constant dense<0.000000e+00> : vector<64x16xf32>
    %27 = tpu.matmul %24, %26, %cst_18 {dimension_numbers = #tpu.dot_dimension_numbers<[1], [0], [0], [1], [0, 0, 1, 1], [], []>} : vector<64x16xbf16>, vector<16x16xbf16>, vector<64x16xf32> -> vector<64x16xf32>
    %28 = arith.addf %19, %27 : vector<64x16xf32>
    %c1_i32_19 = arith.constant 1 : i32
    %29 = arith.addi %0, %c1_i32_19 : i32
    %c0_20 = arith.constant 0 : index
    %30 = arith.index_cast %29 : i32 to index
    %c1_21 = arith.constant 1 : index
    %c0_22 = arith.constant 0 : index
    %31 = vector.load %arg2[%c0_20, %30, %c1_21, %c0_22] : memref<1x9x9x16xbf16, #tpu.memory_space<vmem>>, vector<1x8x8x16xbf16>
    %32 = vector.shape_cast %31 : vector<1x8x8x16xbf16> to vector<8x8x16xbf16>
    %33 = vector.shape_cast %32 : vector<8x8x16xbf16> to vector<64x16xbf16>
    %c3 = arith.constant 3 : index
    %c0_23 = arith.constant 0 : index
    %c0_24 = arith.constant 0 : index
    %34 = vector.load %arg3[%c3, %c0_23, %c0_24] : memref<4x16x16xbf16, #tpu.memory_space<vmem>>, vector<1x16x16xbf16>
    %35 = vector.shape_cast %34 : vector<1x16x16xbf16> to vector<16x16xbf16>
    %cst_25 = arith.constant dense<0.000000e+00> : vector<64x16xf32>
    %36 = tpu.matmul %33, %35, %cst_25 {dimension_numbers = #tpu.dot_dimension_numbers<[1], [0], [0], [1], [0, 0, 1, 1], [], []>} : vector<64x16xbf16>, vector<16x16xbf16>, vector<64x16xf32> -> vector<64x16xf32>
    %37 = arith.addf %28, %36 : vector<64x16xf32>
    %c0_26 = arith.constant 0 : index
    %c0_27 = arith.constant 0 : index
    %38 = vector.load %arg4[%c0_26, %c0_27] : memref<1x16xf32, #tpu.memory_space<vmem>>, vector<1x16xf32>
    %39 = vector.broadcast %38 : vector<1x16xf32> to vector<64x16xf32>
    %40 = arith.addf %37, %39 : vector<64x16xf32>
    %cst_28 = arith.constant 0.000000e+00 : f32
    %41 = vector.broadcast %cst_28 : f32 to vector<64x16xf32>
    %42 = arith.cmpf oge, %40, %41 : vector<64x16xf32>
    %cst_29 = arith.constant 0.00999999977 : f32
    %43 = vector.broadcast %cst_29 : f32 to vector<64x16xf32>
    %44 = arith.mulf %43, %40 : vector<64x16xf32>
    %45 = arith.select %42, %40, %44 : vector<64x16xi1>, vector<64x16xf32>
    %c0_30 = arith.constant 0 : index
    %c0_31 = arith.constant 0 : index
    %c0_32 = arith.constant 0 : index
    %46 = vector.load %arg5[%c0_30, %c0_31, %c0_32] : memref<1x64x16xf32, #tpu.memory_space<vmem>>, vector<1x64x16xf32>
    %47 = vector.shape_cast %46 : vector<1x64x16xf32> to vector<64x16xf32>
    %48 = vector.shape_cast %45 : vector<64x16xf32> to vector<1x64x16xf32>
    tpu.vector_store %arg5[%c0_30, %c0_31, %c0_32], %48 {strides = array<i32>} : memref<1x64x16xf32, #tpu.memory_space<vmem>>, vector<1x64x16xf32>,
    %c0_i32_33 = arith.constant 0 : i32
    %49 = arith.cmpi eq, %arg1, %c0_i32_33 : i32
    %50 = arith.extui %49 : i1 to i32
    %c0_i32_34 = arith.constant 0 : i32
    %51 = arith.cmpi ne, %50, %c0_i32_34 : i32
    scf.if %51 {
      %cst_49 = arith.constant 0.000000e+00 : f32
      %65 = vector.broadcast %cst_49 : f32 to vector<1x1x16xf32>
      %c0_50 = arith.constant 0 : index
      %c0_51 = arith.constant 0 : index
      %c0_52 = arith.constant 0 : index
      %66 = vector.load %arg6[%c0_50, %c0_51, %c0_52] : memref<1x1x16xf32, #tpu.memory_space<vmem>>, vector<1x1x16xf32>
      tpu.vector_store %arg6[%c0_50, %c0_51, %c0_52], %65 {strides = array<i32>} : memref<1x1x16xf32, #tpu.memory_space<vmem>>, vector<1x1x16xf32>,
      %cst_53 = arith.constant 0.000000e+00 : f32
      %67 = vector.broadcast %cst_53 : f32 to vector<1x1x16xf32>
      %c0_54 = arith.constant 0 : index
      %c0_55 = arith.constant 0 : index
      %c0_56 = arith.constant 0 : index
      %68 = vector.load %arg7[%c0_54, %c0_55, %c0_56] : memref<1x1x16xf32, #tpu.memory_space<vmem>>, vector<1x1x16xf32>
      tpu.vector_store %arg7[%c0_54, %c0_55, %c0_56], %67 {strides = array<i32>} : memref<1x1x16xf32, #tpu.memory_space<vmem>>, vector<1x1x16xf32>,
    } else {
    }
    %c0_35 = arith.constant 0 : index
    %c0_36 = arith.constant 0 : index
    %c0_37 = arith.constant 0 : index
    %52 = vector.load %arg6[%c0_35, %c0_36, %c0_37] : memref<1x1x16xf32, #tpu.memory_space<vmem>>, vector<1x1x16xf32>
    %cst_38 = arith.constant dense<0.000000e+00> : vector<16xf32>
    %53 = vector.multi_reduction <add>, %45, %cst_38 [0] : vector<64x16xf32> to vector<16xf32>
    %54 = vector.shape_cast %53 : vector<16xf32> to vector<1x16xf32>
    %55 = vector.shape_cast %54 : vector<1x16xf32> to vector<1x1x16xf32>
    %56 = arith.addf %52, %55 : vector<1x1x16xf32>
    %c0_39 = arith.constant 0 : index
    %c0_40 = arith.constant 0 : index
    %c0_41 = arith.constant 0 : index
    %57 = vector.load %arg6[%c0_39, %c0_40, %c0_41] : memref<1x1x16xf32, #tpu.memory_space<vmem>>, vector<1x1x16xf32>
    tpu.vector_store %arg6[%c0_39, %c0_40, %c0_41], %56 {strides = array<i32>} : memref<1x1x16xf32, #tpu.memory_space<vmem>>, vector<1x1x16xf32>,
    %c0_42 = arith.constant 0 : index
    %c0_43 = arith.constant 0 : index
    %c0_44 = arith.constant 0 : index
    %58 = vector.load %arg7[%c0_42, %c0_43, %c0_44] : memref<1x1x16xf32, #tpu.memory_space<vmem>>, vector<1x1x16xf32>
    %59 = arith.mulf %45, %45 : vector<64x16xf32>
    %cst_45 = arith.constant dense<0.000000e+00> : vector<16xf32>
    %60 = vector.multi_reduction <add>, %59, %cst_45 [0] : vector<64x16xf32> to vector<16xf32>
    %61 = vector.shape_cast %60 : vector<16xf32> to vector<1x16xf32>
    %62 = vector.shape_cast %61 : vector<1x16xf32> to vector<1x1x16xf32>
    %63 = arith.addf %58, %62 : vector<1x1x16xf32>
    %c0_46 = arith.constant 0 : index
    %c0_47 = arith.constant 0 : index
    %c0_48 = arith.constant 0 : index
    %64 = vector.load %arg7[%c0_46, %c0_47, %c0_48] : memref<1x1x16xf32, #tpu.memory_space<vmem>>, vector<1x1x16xf32>
    tpu.vector_store %arg7[%c0_46, %c0_47, %c0_48], %63 {strides = array<i32>} : memref<1x1x16xf32, #tpu.memory_space<vmem>>, vector<1x1x16xf32>,
    return
  }
  func.func @transform_0(%arg0: i32, %arg1: i32) -> (i32, i32, i32, i32) {
    %c0_i32 = arith.constant 0 : i32
    %c0_i32_0 = arith.constant 0 : i32
    %c0_i32_1 = arith.constant 0 : i32
    %c0_i32_2 = arith.constant 0 : i32
    return %arg0, %c0_i32, %c0_i32_0, %c0_i32_1 : i32, i32, i32, i32
  }
  func.func @transform_1(%arg0: i32, %arg1: i32) -> (i32, i32, i32) {
    %c0_i32 = arith.constant 0 : i32
    %c0_i32_0 = arith.constant 0 : i32
    %c0_i32_1 = arith.constant 0 : i32
    %c0_i32_2 = arith.constant 0 : i32
    return %c0_i32, %c0_i32_0, %c0_i32_1 : i32, i32, i32
  }
  func.func @transform_2(%arg0: i32, %arg1: i32) -> (i32, i32) {
    %c0_i32 = arith.constant 0 : i32
    %c0_i32_0 = arith.constant 0 : i32
    %c0_i32_1 = arith.constant 0 : i32
    return %c0_i32, %c0_i32_0 : i32, i32
  }
  func.func @transform_3(%arg0: i32, %arg1: i32) -> (i32, i32, i32) {
    %c0_i32 = arith.constant 0 : i32
    %c0_i32_0 = arith.constant 0 : i32
    return %arg0, %arg1, %c0_i32 : i32, i32, i32
  }
  func.func @transform_4(%arg0: i32, %arg1: i32) -> (i32, i32, i32) {
    %c0_i32 = arith.constant 0 : i32
    %c0_i32_0 = arith.constant 0 : i32
    %c0_i32_1 = arith.constant 0 : i32
    return %arg0, %c0_i32, %c0_i32_0 : i32, i32, i32
  }
  func.func @transform_5(%arg0: i32, %arg1: i32) -> (i32, i32, i32) {
    %c0_i32 = arith.constant 0 : i32
    %c0_i32_0 = arith.constant 0 : i32
    %c0_i32_1 = arith.constant 0 : i32
    return %arg0, %c0_i32, %c0_i32_0 : i32, i32, i32
  }
}

module attributes {stable_mosaic.version = 11 : i64} {
  func.func @_bn_apply_kernel(%arg0: i32, %arg1: memref<16x128xf32, #tpu.memory_space<vmem>>, %arg2: memref<1x128xf32, #tpu.memory_space<vmem>>, %arg3: memref<1x128xf32, #tpu.memory_space<vmem>>, %arg4: memref<16x128xf32, #tpu.memory_space<vmem>>) attributes {dimension_semantics = [#tpu.dimension_semantics<parallel>], iteration_bounds = array<i64: 1>, scalar_prefetch = 0 : i64, scratch_operands = 0 : i64, tpu.core_type = #tpu.core_type<tc>, window_params = [{transform_indices = @transform_0, window_bounds = array<i64: 16, 128>}, {pipeline_mode = #tpu.pipeline_mode<synchronous>, transform_indices = @transform_1, window_bounds = array<i64: 1, 128>}, {pipeline_mode = #tpu.pipeline_mode<synchronous>, transform_indices = @transform_2, window_bounds = array<i64: 1, 128>}, {transform_indices = @transform_3, window_bounds = array<i64: 16, 128>}]} {
    %c0 = arith.constant 0 : index
    %c0_0 = arith.constant 0 : index
    %0 = vector.load %arg1[%c0, %c0_0] : memref<16x128xf32, #tpu.memory_space<vmem>>, vector<16x128xf32>
    %c0_1 = arith.constant 0 : index
    %c0_2 = arith.constant 0 : index
    %1 = vector.load %arg2[%c0_1, %c0_2] : memref<1x128xf32, #tpu.memory_space<vmem>>, vector<1x128xf32>
    %2 = vector.broadcast %1 : vector<1x128xf32> to vector<16x128xf32>
    %3 = arith.mulf %0, %2 : vector<16x128xf32>
    %c0_3 = arith.constant 0 : index
    %c0_4 = arith.constant 0 : index
    %4 = vector.load %arg3[%c0_3, %c0_4] : memref<1x128xf32, #tpu.memory_space<vmem>>, vector<1x128xf32>
    %5 = vector.broadcast %4 : vector<1x128xf32> to vector<16x128xf32>
    %6 = arith.addf %3, %5 : vector<16x128xf32>
    %c0_5 = arith.constant 0 : index
    %c0_6 = arith.constant 0 : index
    %7 = vector.load %arg4[%c0_5, %c0_6] : memref<16x128xf32, #tpu.memory_space<vmem>>, vector<16x128xf32>
    tpu.vector_store %arg4[%c0_5, %c0_6], %6 {strides = array<i32>} : memref<16x128xf32, #tpu.memory_space<vmem>>, vector<16x128xf32>,
    return
  }
  func.func @transform_0(%arg0: i32) -> (i32, i32) {
    %c0_i32 = arith.constant 0 : i32
    %c0_i32_0 = arith.constant 0 : i32
    return %arg0, %c0_i32 : i32, i32
  }
  func.func @transform_1(%arg0: i32) -> (i32, i32) {
    %c0_i32 = arith.constant 0 : i32
    %c0_i32_0 = arith.constant 0 : i32
    %c0_i32_1 = arith.constant 0 : i32
    return %c0_i32, %c0_i32_0 : i32, i32
  }
  func.func @transform_2(%arg0: i32) -> (i32, i32) {
    %c0_i32 = arith.constant 0 : i32
    %c0_i32_0 = arith.constant 0 : i32
    %c0_i32_1 = arith.constant 0 : i32
    return %c0_i32, %c0_i32_0 : i32, i32
  }
  func.func @transform_3(%arg0: i32) -> (i32, i32) {
    %c0_i32 = arith.constant 0 : i32
    %c0_i32_0 = arith.constant 0 : i32
    return %arg0, %c0_i32 : i32, i32
  }
}

</mosaic_0001>

<bundles_post_ra>
// kernel: tile.13
= control target key start
LH: loop header
LB: loop body
LE: loop exit
PB: predicated region body
PF: predicated region fallthrough
CT: control target
= control target key end

     0   :  { %s22_s0 = inlined_call_operand.vmem [shape: f32[16], index: 0, kind: input, shape index: {}]   ;;  %s23_s1 = inlined_call_operand.vmem [shape: f32[8,16], index: 1, kind: output, shape index: {}]  }
   0x1   :  { %v4_v0 = vld [vmem:[%s22_s0] ss:$0 sm:$0xff] }
   0x2   :  { %5 = vst [vmem:[%s23_s1] sm:$0xff] %v4_v0 }

// kernel: tile.14
= control target key start
LH: loop header
LB: loop body
LE: loop exit
PB: predicated region body
PF: predicated region fallthrough
CT: control target
= control target key end

     0   :  { %s69_s10 = smov 112   ;;  %s70_s11 = smov 80   ;;  %vm3_vm0 = vcmask 130048   ;;  %vm9_vm1 = vcmask 1048448   ;;  %vm15_vm2 = vcmask 917248   ;;  %vm21_vm3 = vcmask 786048   ;;  %s113_s0 = inlined_call_operand.vmem [shape: f32[8,16], index: 0, kind: input, shape index: {}]   ;;  %s114_s1 = inlined_call_operand.vmem [shape: f32[1,128], index: 1, kind: output, shape index: {}]  }
   0x1   :  { %v55_v0 = vld [vmem:[%s113_s0 + $0x7] sm:$0x1]   ;;  %v57_v1 = vld [vmem:[%s113_s0 + $0x5] sm:$0x1]   ;;  %v56_v2 = vld [vmem:[%s113_s0 + $0x6] sm:$0x1]  }
   0x2   :  { %7 = vrot.lane.b32.xlu0 %v55_v0, %s69_s10  ;;  %19 = vrot.lane.b32.xlu1 %v57_v1, %s70_s11  ;;  %v58_v3 = vld [vmem:[%s113_s0 + $0x4] sm:$0x1]   ;;  %v2_v4 = vld [vmem:[%s113_s0] sm:$0x1]   ;;  %s71_s18 = smov 96   ;;  %s72_s19 = smov 64  }
   0x3   :  { %4 = vst.msk [vmem:[#allocation0] sm:$0x1] %vm3_vm0, %v2_v4   ;;  %v59_v5 = vld [vmem:[%s113_s0 + $0x3] sm:$0x1]   ;;  %v60_v6 = vld [vmem:[%s113_s0 + $0x2] sm:$0x1]  }
   0x4   :  { %s73_s24 = smov 48   ;;  %s74_s25 = smov 32   ;;  %v61_v7 = vld [vmem:[%s113_s0 + $0x1] sm:$0x1]   ;;  %vm27_vm4 = vcmask 654848   ;;  %vm33_vm5 = vcmask 523648  }
   0x5   :  { %s75_s0 = smov 16   ;;  %vm39_vm6 = vcmask 392448   ;;  %vm45_vm7 = vcmask 261248  }
   0x6   :  { %13 = vrot.lane.b32.xlu0 %v56_v2, %s71_s18  ;;  %25 = vrot.lane.b32.xlu1 %v58_v3, %s72_s19 }
   0xa   :  { %31 = vrot.lane.b32.xlu0 %v59_v5, %s73_s24  ;;  %37 = vrot.lane.b32.xlu1 %v60_v6, %s74_s25 }
   0xe   :  { %43 = vrot.lane.b32.xlu0 %v61_v7, %s75_s0 }
  0x74   :  { %v8_v8 = vpop.permute.xlu0 %7   ;;  %v20_v9 = vpop.permute.xlu1 %19  }
  0x75   :  { %10 = vst.msk [vmem:[#allocation0] sm:$0x1] %vm9_vm1, %v8_v8  }
  0x78   :  { %v14_v10 = vpop.permute.xlu0 %13   ;;  %v26_v11 = vpop.permute.xlu1 %25  }
  0x79   :  { %16 = vst.msk [vmem:[#allocation0] sm:$0x1] %vm15_vm2, %v14_v10  }
  0x7a   :  { %22 = vst.msk [vmem:[#allocation0] sm:$0x1] %vm21_vm3, %v20_v9  }
  0x7b   :  { %28 = vst.msk [vmem:[#allocation0] sm:$0x1] %vm27_vm4, %v26_v11  }
  0x7c   :  { %v32_v12 = vpop.permute.xlu0 %31   ;;  %v38_v13 = vpop.permute.xlu1 %37  }
  0x7d   :  { %34 = vst.msk [vmem:[#allocation0] sm:$0x1] %vm33_vm5, %v32_v12  }
  0x7e   :  { %40 = vst.msk [vmem:[#allocation0] sm:$0x1] %vm39_vm6, %v38_v13  }
  0x80   :  { %v44_v14 = vpop.permute.xlu0 %43  }
  0x81   :  { %46 = vst.msk [vmem:[#allocation0] sm:$0x1] %vm45_vm7, %v44_v14  }
  0x88   :  { %v51_v15 = vld [vmem:[#allocation0] sm:$0x1] }
  0x89   :  { %54 = vst [vmem:[%s114_s1] sm:$0x1] %v51_v15 }

// kernel: strided_conv_relu_bn.3
= control target key start
LH: loop header
LB: loop body
LE: loop exit
PB: predicated region body
PF: predicated region fallthrough
CT: control target
= control target key end

     0   :  { %s80_s0 = inlined_call_operand.vmem [shape: f32[16,128], index: 0, kind: input, shape index: {}]   ;;  %s81_s1 = inlined_call_operand.vmem [shape: f32[1,128], index: 1, kind: input, shape index: {}]   ;;  %s82_s2 = inlined_call_operand.vmem [shape: f32[1,128], index: 2, kind: input, shape index: {}]   ;;  %s83_s3 = inlined_call_operand.vmem [shape: f32[16,128], index: 3, kind: output, shape index: {}]  }
   0x1   :  { %v14_v0 = vld [vmem:[%s80_s0] sm:$0xff]  ;;  %v15_v4 = vld [vmem:[%s80_s0 + $0x8] sm:$0xff] }
   0x2   :  { %v40_v1 = vld [vmem:[%s81_s1] ss:$0 sm:$0xff] }
   0x3   :  { %v41_v2 = vld [vmem:[%s82_s2] ss:$0 sm:$0xff]  ;;  %v23_v3 = vmul.f32 %v40_v1, %v14_v0  ;;  %v24_v5 = vmul.f32 %v40_v1, %v15_v4 }
   0x5   :  { %v32_v6 = vadd.f32 %v41_v2, %v23_v3  ;;  %v33_v7 = vadd.f32 %v41_v2, %v24_v5 }
   0x7   :  { %34 = vst [vmem:[%s83_s3] sm:$0xff] %v32_v6  ;;  %35 = vst [vmem:[%s83_s3 + $0x8] sm:$0xff] %v33_v7 }

// kernel: strided_conv_relu_bn.2
= control target key start
LH: loop header
LB: loop body
LE: loop exit
PB: predicated region body
PF: predicated region fallthrough
CT: control target
= control target key end

     0   :  { %s1444_s18 = smov 0   ;;  %s1446_s19 = smov 0   ;;  %s1658_s0 = inlined_call_operand.vmem [shape: bf16[2,9,9,16], index: 0, kind: input, shape index: {}]   ;;  %s1659_s1 = inlined_call_operand.vmem [shape: bf16[4,16,16], index: 1, kind: input, shape index: {}]   ;;  %s1660_s2 = inlined_call_operand.vmem [shape: f32[1,16], index: 2, kind: input, shape index: {}]   ;;  %s1661_s3 = inlined_call_operand.vmem [shape: f32[2,64,16], index: 3, kind: output, shape index: {0}]   ;;  %s1662_s4 = inlined_call_operand.vmem [shape: f32[2,1,16], index: 4, kind: output, shape index: {1}]   ;;  %s1663_s5 = inlined_call_operand.vmem [shape: f32[2,1,16], index: 5, kind: output, shape index: {2}]  }
   0x1   :  { %s1448_s20 = smov 0  }
   0x2 LB: > { %s28_s21 = sadd.s32 1, %s1407_s19  ;;  %p1217_p0 = scmp.ge.s32.totalorder %s1411_s20, 1  ;;  %s1411_s20 = sphi %s1448_s20, %s16_s20   ;;  %s1407_s19 = sphi %s1446_s19, %s1667_s19   ;;  %s1403_s18 = sphi %s1444_s18, %s1666_s18  }
   0x3   : > { %p30_p1 = scmp.ge.s32.totalorder %s28_s21, 2  ;;  %p206_p2 = scmp.lt.s32.totalorder %s1411_s20, 3 }
   0x5   : > { %s1669_s21 = smov (%p30_p1, %s28_s21), 0  ;;  %p207_p3 = pnand %p1217_p0, %p206_p2 }
   0x6   : > { %p244_p4 = scmp.lt.s32.totalorder (!%p207_p3), %s1403_s18, 1 }
   0x7   : > { %210 = sbr.rel (%p207_p3) target bundleno = 293 (0x125), region = 32 }
   0xc   : > { %v1377_v0 = vld [vmem:[%s1659_s1] sm:$0xff]   ;;  %v1378_v1 = vld [vmem:[%s1659_s1 + $0x8] sm:$0xff]   ;;  %s1671_s18 = smov (!%p244_p4, %s1403_s18), 1  ;;  %v1473_v2 = vld [vmem:[%s1659_s1 + $0x10] sm:$0xff]   ;;  %vm424_vm0 = vcmask 130048   ;;  %vm1016_vm4 = vcmask 122880  }
   0xd   : > { %1321 = vmatprep.subr.bf16.mxu1 %v1377_v0  ;;  %1311 = vmatprep.subr.bf16.mxu0 %v1378_v1  ;;  %s1351_s28 = smul.u32 72, %s1671_s18  ;;  %v1382_v3 = vld [vmem:[%s1659_s1 + $0x18] sm:$0xff]   ;;  %vm288_vm1 = vsmask.f32 3328  ;;  %vm289_vm2 = vsmask.f32 7440  ;;  %s1580_s11 = scalar_lea.vmem %s1662_s4, %s1671_s18 }
   0xe   : > { %1322 = vmatpush3.bf16.msra.mxu1 %v1377_v0  ;;  %1312 = vmatpush3.bf16.msra.mxu0 %v1378_v1  ;;  %vm1496_vm3 = vmor %vm288_vm1, %vm289_vm2  ;;  %s1586_s14 = scalar_lea.vmem %s1663_s5, %s1671_s18  ;;  %s1290_s17 = sshll.u32 %s1671_s18, 6 }
   0xf   : > { %1331 = vmatprep.subr.bf16.mxu0 %v1473_v2  ;;  %s1483_s8 = scalar_lea.vmem %s1658_s0, %s1351_s28  ;;  %1341 = vmatprep.subr.bf16.mxu1 %v1382_v3  ;;  %s1602_s24 = scalar_lea.vmem %s1661_s3, %s1290_s17 }
  0x10   : > { %v270_v4 = vld [vmem:[%s1483_s8] sm:$0xf]  ;;  %v271_v5 = vld [vmem:[%s1483_s8 + $0x8] sm:$0xf]  ;;  %v272_v6 = vld [vmem:[%s1483_s8 + $0x10] sm:$0xf] }
  0x11   : > { %v292_v7 = vshrl.u32 %v270_v4, 16  ;;  %v295_v8 = vshll.u32 %v270_v4, 16  ;;  %v306_v9 = vshrl.u32 %v271_v5, 16  ;;  %v309_v10 = vshll.u32 %v271_v5, 16  ;;  %v273_v11 = vld [vmem:[%s1483_s8 + $0x18] sm:$0xf] }
  0x12   : > { %v1232_v12 = vcombine.low %v270_v4, %v271_v5  ;;  %v320_v13 = vshrl.u32 %v272_v6, 16  ;;  %v323_v14 = vshll.u32 %v272_v6, 16  ;;  %v334_v15 = vshrl.u32 %v273_v11, 16  ;;  %v280_v16 = vld [vmem:[%s1483_s8 + $0x4] sm:$0x1] }
  0x13   : > { %v294_v17 = vrot.slane %v292_v7, 4  ;;  %v297_v18 = vrot.slane %v295_v8, 5  ;;  %v308_v19 = vrot.slane %v306_v9, 4  ;;  %v311_v20 = vrot.slane %v309_v10, 5  ;;  %v281_v21 = vld [vmem:[%s1483_s8 + $0xc] sm:$0x1] }
  0x14   : > { %1323 = vmatprep.mubr.msk.bf16.mxu1 %vm424_vm0, %v1232_v12  ;;  %v322_v22 = vrot.slane %v320_v13, 4  ;;  %v325_v23 = vrot.slane %v323_v14, 5  ;;  %v336_v24 = vrot.slane %v334_v15, 4  ;;  %v337_v25 = vshll.u32 %v273_v11, 16  ;;  %v282_v26 = vld [vmem:[%s1483_s8 + $0x14] sm:$0x1] }
  0x15   : > { %v1233_v27 = vcombine.low %v272_v6, %v273_v11  ;;  %v298_v28 = vor.u32 %v297_v18, %v294_v17  ;;  %v301_v29 = vshll.u32 %v280_v16, 16  ;;  %v312_v30 = vor.u32 %v311_v20, %v308_v19  ;;  %v283_v31 = vld [vmem:[%s1483_s8 + $0x1c] sm:$0x1]  ;;  %v274_v37 = vld [vmem:[%s1483_s8 + $0x20] sm:$0xf] }
  0x16   : > { %v339_v32 = vrot.slane %v337_v25, 5  ;;  %v315_v34 = vshll.u32 %v281_v21, 16  ;;  %v326_v35 = vor.u32 %v325_v23, %v322_v22  ;;  %v329_v36 = vshll.u32 %v282_v26, 16  ;;  %v275_v42 = vld [vmem:[%s1483_s8 + $0x28] sm:$0xf] }
  0x17   : > { %1324 = vmatmul.mubr.msk.bf16.vlgmr.msra.gmra.mxu1 %vm424_vm0, %v1233_v27  ;;  %v299_v38 = vrot.slane %v298_v28, 4  ;;  %v303_v39 = vrot.slane %v301_v29, 5  ;;  %v313_v40 = vrot.slane %v312_v30, 4  ;;  %v343_v41 = vshll.u32 %v283_v31, 16  ;;  %v276_v51 = vld [vmem:[%s1483_s8 + $0x30] sm:$0xf] }
  0x18   : > { %v317_v43 = vrot.slane %v315_v34, 5  ;;  %v327_v44 = vrot.slane %v326_v35, 4  ;;  %v331_v45 = vrot.slane %v329_v36, 5  ;;  %v340_v46 = vor.u32 %v339_v32, %v336_v24  ;;  %1342 = vmatpush3.bf16.msra.mxu1 %v1382_v3  ;;  %v277_v56 = vld [vmem:[%s1483_s8 + $0x38] sm:$0xf] }
  0x19   : > { %v304_v47 = vsel %vm1496_vm3, %v299_v38, %v303_v39  ;;  %v345_v48 = vrot.slane %v343_v41, 5  ;;  %v348_v49 = vshrl.u32 %v274_v37, 16  ;;  %v351_v50 = vshll.u32 %v274_v37, 16  ;;  %v284_v1 = vld [vmem:[%s1483_s8 + $0x24] sm:$0x1] }
  0x1a   : > { %v318_v52 = vsel %vm1496_vm3, %v313_v40, %v317_v43  ;;  %v332_v53 = vsel %vm1496_vm3, %v327_v44, %v331_v45  ;;  %v341_v54 = vrot.slane %v340_v46, 4  ;;  %v362_v55 = vshrl.u32 %v275_v42, 16  ;;  %v285_v3 = vld [vmem:[%s1483_s8 + $0x2c] sm:$0x1]  ;;  %v286_v8 = vld [vmem:[%s1483_s8 + $0x34] sm:$0x1] }
  0x1b   : > { %v1223_v57 = vcombine.low %v304_v47, %v318_v52  ;;  %v350_v58 = vrot.slane %v348_v49, 4  ;;  %v353_v59 = vrot.slane %v351_v50, 5  ;;  %v365_v60 = vshll.u32 %v275_v42, 16  ;;  %v287_v13 = vld [vmem:[%s1483_s8 + $0x3c] sm:$0x1] }
  0x1c   : > { %v346_v61 = vsel %vm1496_vm3, %v341_v54, %v345_v48  ;;  %v364_v62 = vrot.slane %v362_v55, 4  ;;  %v1234_v63 = vcombine.low %v274_v37, %v275_v42  ;;  %v376_v0 = vshrl.u32 %v276_v51, 16  ;;  %v1260_v14 = vld [vmem:[%s1483_s8 + $0x8] sm:$0xf]  ;;  %v1261_v19 = vld [vmem:[%s1483_s8 + $0xc] sm:$0x1] }
  0x1d   : > { %1313 = vmatprep.mubr.msk.bf16.mxu0 %vm424_vm0, %v1223_v57  ;;  %v1224_v4 = vcombine.low %v332_v53, %v346_v61  ;;  %v367_v5 = vrot.slane %v365_v60, 5  ;;  %v379_v6 = vshll.u32 %v276_v51, 16  ;;  %v390_v7 = vshrl.u32 %v277_v56, 16  ;;  %v1262_v24 = vld [vmem:[%s1483_s8 + $0x10] sm:$0xf] }
  0x1e   : > { %1327 = vmatprep.mubr.msk.bf16.mxu1 %vm424_vm0, %v1234_v63  ;;  %v378_v9 = vrot.slane %v376_v0, 4  ;;  %v393_v10 = vshll.u32 %v277_v56, 16  ;;  %v1235_v11 = vcombine.low %v276_v51, %v277_v56  ;;  %v354_v12 = vor.u32 %v353_v59, %v350_v58  ;;  %v1263_v29 = vld [vmem:[%s1483_s8 + $0x14] sm:$0x1]  ;;  %v1265_v39 = vld [vmem:[%s1483_s8 + $0x1c] sm:$0x1] }
  0x1f   : > { %1314 = vmatmul.mubr.msk.bf16.vlgmr.msra.gmra.mxu0 %vm424_vm0, %v1224_v4  ;;  %v381_v15 = vrot.slane %v379_v6, 5  ;;  %v392_v16 = vrot.slane %v390_v7, 4  ;;  %v357_v17 = vshll.u32 %v284_v1, 16  ;;  %v368_v18 = vor.u32 %v367_v5, %v364_v62  ;;  %v1266_v44 = vld [vmem:[%s1483_s8 + $0x20] sm:$0xf] }
  0x20   : > { %1332 = vmatpush3.bf16.msra.mxu0 %v1473_v2  ;;  %v395_v20 = vrot.slane %v393_v10, 5  ;;  %1328 = vmatmul.mubr.msk.bf16.gmra.mxu1 %vm424_vm0, %v1235_v11  ;;  %v355_v21 = vrot.slane %v354_v12, 4  ;;  %v371_v22 = vshll.u32 %v285_v3, 16  ;;  %v385_v23 = vshll.u32 %v286_v8, 16  ;;  %v1264_v2 = vld [vmem:[%s1483_s8 + $0x18] sm:$0xf] }
  0x21   : > { %v359_v25 = vrot.slane %v357_v17, 5  ;;  %v369_v26 = vrot.slane %v368_v18, 4  ;;  %v382_v27 = vor.u32 %v381_v15, %v378_v9  ;;  %v399_v28 = vshll.u32 %v287_v13, 16  ;;  %v1385_v53 = vld [vmem:[%s1483_s8 + $0x8] ss:$8 sps:$4 sm:$0xff]  }
  0x22   : > { %v373_v30 = vrot.slane %v371_v22, 5  ;;  %v387_v31 = vrot.slane %v385_v23, 5  ;;  %v396_v32 = vor.u32 %v395_v20, %v392_v16  ;;  %v748_v34 = vshrl.u32 %v1260_v14, 16  ;;  %v1267_v57 = vld [vmem:[%s1483_s8 + $0x24] sm:$0x1] }
  0x23   : > { %v360_v35 = vsel %vm1496_vm3, %v355_v21, %v359_v25  ;;  %v383_v36 = vrot.slane %v382_v27, 4  ;;  %v401_v37 = vrot.slane %v399_v28, 5  ;;  %v751_v38 = vshll.u32 %v1260_v14, 16  ;;  %v1268_v63 = vld [vmem:[%s1483_s8 + $0x28] sm:$0xf] }
  0x24   : > { %v374_v40 = vsel %vm1496_vm3, %v369_v26, %v373_v30  ;;  %v397_v41 = vrot.slane %v396_v32, 4  ;;  %v750_v42 = vrot.slane %v748_v34, 4  ;;  %v757_v43 = vshll.u32 %v1261_v19, 16  ;;  %v1269_v5 = vld [vmem:[%s1483_s8 + $0x2c] sm:$0x1] }
  0x25   : > { %v1225_v45 = vcombine.low %v360_v35, %v374_v40  ;;  %v388_v46 = vsel %vm1496_vm3, %v383_v36, %v387_v31  ;;  %v753_v47 = vrot.slane %v751_v38, 5  ;;  %v762_v48 = vshrl.u32 %v1262_v24, 16  ;;  %v1270_v10 = vld [vmem:[%s1483_s8 + $0x30] sm:$0xf]  ;;  %v1386_v14 = vld [vmem:[%s1483_s8 + $0x18] ss:$8 sps:$4 sm:$0xff]  }
  0x26   : > { %v402_v49 = vsel %vm1496_vm3, %v397_v41, %v401_v37  ;;  %v759_v50 = vrot.slane %v757_v43, 5  ;;  %v765_v51 = vshll.u32 %v1262_v24, 16  ;;  %v771_v52 = vshll.u32 %v1263_v29, 16  ;;  %v1271_v15 = vld [vmem:[%s1483_s8 + $0x34] sm:$0x1] }
  0x27   : > { %1317 = vmatprep.mubr.msk.bf16.mxu0 %vm424_vm0, %v1225_v45  ;;  %v1226_v54 = vcombine.low %v388_v46, %v402_v49  ;;  %v754_v55 = vor.u32 %v753_v47, %v750_v42  ;;  %v764_v56 = vrot.slane %v762_v48, 4  ;;  %v776_v58 = vshrl.u32 %v1264_v2, 16  ;;  %v1272_v21 = vld [vmem:[%s1483_s8 + $0x38] sm:$0xf]  ;;  %v1273_v26 = vld [vmem:[%s1483_s8 + $0x3c] sm:$0x1] }
  0x28   : > { %v767_v59 = vrot.slane %v765_v51, 5  ;;  %v773_v60 = vrot.slane %v771_v52, 5  ;;  %v779_v61 = vshll.u32 %v1264_v2, 16  ;;  %v785_v62 = vshll.u32 %v1265_v39, 16  ;;  %v1274_v31 = vld [vmem:[%s1483_s8 + $0x40] sm:$0xf] }
  0x29   : > { %1318 = vmatmul.mubr.msk.bf16.gmra.mxu0 %vm424_vm0, %v1226_v54  ;;  %v755_v0 = vrot.slane %v754_v55, 4  ;;  %v778_v1 = vrot.slane %v776_v58, 4  ;;  %v790_v3 = vshrl.u32 %v1266_v44, 16  ;;  %v793_v4 = vshll.u32 %v1266_v44, 16  ;;  %v1275_v36 = vld [vmem:[%s1483_s8 + $0x44] sm:$0x1] }
  0x2a   : > { %v768_v6 = vor.u32 %v767_v59, %v764_v56  ;;  %v781_v7 = vrot.slane %v779_v61, 5  ;;  %v787_v8 = vrot.slane %v785_v62, 5  ;;  %v799_v9 = vshll.u32 %v1267_v57, 16  ;;  %1333 = vmatprep.mubr.msk.bf16.mxu0 %vm424_vm0, %v1385_v53  ;;  %v1387_v41 = vld [vmem:[%s1483_s8 + $0x28] ss:$8 sps:$4 sm:$0xff]  }
  0x2b   : > { %v760_v11 = vsel %vm1496_vm3, %v755_v0, %v759_v50  ;;  %v792_v12 = vrot.slane %v790_v3, 4  ;;  %v795_v13 = vrot.slane %v793_v4, 5  ;;  %v804_v16 = vshrl.u32 %v1268_v63, 16  ;;  %v1388_v59 = vld [vmem:[%s1483_s8 + $0x38] ss:$8 sps:$4 sm:$0xff]  }
  0x2c   : > { %v769_v17 = vrot.slane %v768_v6, 4  ;;  %v782_v18 = vor.u32 %v781_v7, %v778_v1  ;;  %v801_v19 = vrot.slane %v799_v9, 5  ;;  %v807_v20 = vshll.u32 %v1268_v63, 16 }
  0x2d   : > { %v796_v22 = vor.u32 %v795_v13, %v792_v12  ;;  %v806_v23 = vrot.slane %v804_v16, 4  ;;  %v813_v24 = vshll.u32 %v1269_v5, 16  ;;  %v818_v25 = vshrl.u32 %v1270_v10, 16 }
  0x2e   : > { %v774_v27 = vsel %vm1496_vm3, %v769_v17, %v773_v60  ;;  %v783_v28 = vrot.slane %v782_v18, 4  ;;  %v809_v29 = vrot.slane %v807_v20, 5  ;;  %v821_v30 = vshll.u32 %v1270_v10, 16 }
  0x2f   : > { %v1278_v32 = vcombine.low %v760_v11, %v774_v27  ;;  %v797_v34 = vrot.slane %v796_v22, 4  ;;  %v815_v2 = vrot.slane %v813_v24, 5  ;;  %v820_v35 = vrot.slane %v818_v25, 4 }
  0x30   : > { %v788_v37 = vsel %vm1496_vm3, %v783_v28, %v787_v8  ;;  %v810_v38 = vor.u32 %v809_v29, %v806_v23  ;;  %v823_v39 = vrot.slane %v821_v30, 5  ;;  %v827_v40 = vshll.u32 %v1271_v15, 16 }
  0x31   : > { %1343 = vmatprep.mubr.msk.bf16.mxu1 %vm424_vm0, %v1278_v32  ;;  %v802_v42 = vsel %vm1496_vm3, %v797_v34, %v801_v19  ;;  %1334 = vmatmul.mubr.msk.bf16.vlgmr.msra.gmra.mxu0 %vm424_vm0, %v1386_v14  ;;  %v832_v43 = vshrl.u32 %v1272_v21, 16  ;;  %v835_v44 = vshll.u32 %v1272_v21, 16  ;;  %v841_v45 = vshll.u32 %v1273_v26, 16 }
  0x32   : > { %v1279_v46 = vcombine.low %v788_v37, %v802_v42  ;;  %v811_v47 = vrot.slane %v810_v38, 4  ;;  %v824_v48 = vor.u32 %v823_v39, %v820_v35  ;;  %v829_v49 = vrot.slane %v827_v40, 5  ;;  %1337 = vmatprep.mubr.msk.bf16.mxu0 %vm424_vm0, %v1387_v41 }
  0x33   : > { %v834_v50 = vrot.slane %v832_v43, 4  ;;  %v837_v51 = vrot.slane %v835_v44, 5  ;;  %v846_v52 = vshrl.u32 %v1274_v31, 16  ;;  %v849_v55 = vshll.u32 %v1274_v31, 16  ;;  %v1595_v31 = vld [vmem:[%s1660_s2] ss:$0 sm:$0xff] }
  0x34   : > { %1344 = vmatmul.mubr.msk.bf16.vlgmr.msra.gmra.mxu1 %vm424_vm0, %v1279_v46  ;;  %v816_v53 = vsel %vm1496_vm3, %v811_v47, %v815_v2  ;;  %v825_v54 = vrot.slane %v824_v48, 4  ;;  %v855_v56 = vshll.u32 %v1275_v36, 16  ;;  %v843_v61 = vrot.slane %v841_v45, 5 }
  0x35   : > { %v838_v57 = vor.u32 %v837_v51, %v834_v50  ;;  %v848_v58 = vrot.slane %v846_v52, 4  ;;  %v851_v62 = vrot.slane %v849_v55, 5  ;;  %v1413_v8 = vmov 0.0  }
  0x36   : > { %v830_v60 = vsel %vm1496_vm3, %v825_v54, %v829_v49  ;;  %v857_v3 = vrot.slane %v855_v56, 5  ;;  %1017 = vst.msk [vmem:[%s1580_s11] sm:$0x1] %vm1016_vm4, %v1413_v8  ;;  %1018 = vst.msk [vmem:[%s1586_s14] sm:$0x1] %vm1016_vm4, %v1413_v8 }
  0x37   : > { %v1280_v63 = vcombine.low %v816_v53, %v830_v60  ;;  %v839_v0 = vrot.slane %v838_v57, 4  ;;  %v852_v1 = vor.u32 %v851_v62, %v848_v58 }
  0x39   : > { %1347 = vmatprep.mubr.msk.bf16.mxu1 %vm424_vm0, %v1280_v63  ;;  %1338 = vmatmul.mubr.msk.bf16.gmra.mxu0 %vm424_vm0, %v1388_v59  ;;  %v844_v4 = vsel %vm1496_vm3, %v839_v0, %v843_v61  ;;  %v853_v5 = vrot.slane %v852_v1, 4 }
  0x3b   : > { %v858_v6 = vsel %vm1496_vm3, %v853_v5, %v857_v3 }
  0x3c   : > { %v1281_v7 = vcombine.low %v844_v4, %v858_v6 }
  0x3e   : > { %1348 = vmatmul.mubr.msk.bf16.gmra.mxu1 %vm424_vm0, %v1281_v7 }
  0xd7   : > { %v1325_v33 = vpop.f32.mrf.mxu1 }
  0xd9   : > { %v574_v9 = vpop.f32.mrf.mxu1 }
  0xdb   : > { %v1326_v10 = vpop.f32.mrf.mxu1 }
  0xdd   : > { %v577_v12 = vpop.f32.mrf.mxu1 }
  0xdf   : > { %v1315_v11 = vpop.f32.mrf.mxu0 }
  0xe0   : > { %v1329_v15 = vpop.f32.mrf.mxu1  ;;  %v583_v23 = vadd.f32 %v1325_v33, %v1315_v11 }
  0xe1   : > { %v471_v13 = vpop.f32.mrf.mxu0 }
  0xe2   : > { %v590_v17 = vpop.f32.mrf.mxu1  ;;  %v575_v26 = vadd.f32 %v574_v9, %v471_v13 }
  0xe3   : > { %v1316_v14 = vpop.f32.mrf.mxu0 }
  0xe4   : > { %v1330_v20 = vpop.f32.mrf.mxu1  ;;  %v586_v29 = vadd.f32 %v1326_v10, %v1316_v14 }
  0xe5   : > { %v474_v16 = vpop.f32.mrf.mxu0 }
  0xe6   : > { %v593_v24 = vpop.f32.mrf.mxu1  ;;  %v578_v35 = vadd.f32 %v577_v12, %v474_v16 }
  0xe9   : > { %v1319_v18 = vpop.f32.mrf.mxu0 }
  0xea   : > { %v599_v47 = vadd.f32 %v1329_v15, %v1319_v18 }
  0xeb   : > { %v487_v19 = vpop.f32.mrf.mxu0 }
  0xec   : > { %v591_v53 = vadd.f32 %v590_v17, %v487_v19 }
  0xed   : > { %v1320_v21 = vpop.f32.mrf.mxu0 }
  0xee   : > { %v602_v59 = vadd.f32 %v1330_v20, %v1320_v21 }
  0xef   : > { %v490_v22 = vpop.f32.mrf.mxu0 }
  0xf0   : > { %v594_v4 = vadd.f32 %v593_v24, %v490_v22 }
  0xf1   : > { %v1335_v25 = vpop.f32.mrf.mxu0 }
  0xf2   : > { %v725_v27 = vadd.f32 %v1335_v25, %v583_v23 }
  0xf3   : > { %v692_v28 = vpop.f32.mrf.mxu0 }
  0xf4   : > { %v1345_v30 = vpop.f32.mrf.mxu1  ;;  %v723_v32 = vadd.f32 %v692_v28, %v575_v26 }
  0xf5   : > { %v959_v34 = vadd.f32 %v1345_v30, %v725_v27  ;;  %v1336_v2 = vpop.f32.mrf.mxu0 }
  0xf6   : > { %v926_v36 = vpop.f32.mrf.mxu1  ;;  %v726_v37 = vadd.f32 %v1336_v2, %v586_v29 }
  0xf7   : > { %v974_v38 = vadd.f32 %v1595_v31, %v959_v34  ;;  %v957_v39 = vadd.f32 %v926_v36, %v723_v32  ;;  %v695_v40 = vpop.f32.mrf.mxu0 }
  0xf8   : > { %v1346_v41 = vpop.f32.mrf.mxu1  ;;  %v724_v42 = vadd.f32 %v695_v40, %v578_v35 }
  0xf9   : > { %vm982_vm5 = vcmp.ge.f32.partialorder %v974_v38, 0.0  ;;  %v990_v43 = vmul.f32 0.01, %v974_v38  ;;  %v972_v44 = vadd.f32 %v1595_v31, %v957_v39  ;;  %v960_v45 = vadd.f32 %v1346_v41, %v726_v37  ;;  %v1339_v46 = vpop.f32.mrf.mxu0 }
  0xfa   : > { %v929_v50 = vpop.f32.mrf.mxu1  ;;  %v729_v57 = vadd.f32 %v1339_v46, %v599_v47 }
  0xfb   : > { %v998_v48 = vsel %vm982_vm5, %v974_v38, %v990_v43  ;;  %vm980_vm6 = vcmp.ge.f32.partialorder %v972_v44, 0.0  ;;  %v988_v49 = vmul.f32 0.01, %v972_v44  ;;  %v975_v51 = vadd.f32 %v1595_v31, %v960_v45  ;;  %v708_v52 = vpop.f32.mrf.mxu0 }
  0xfc   : > { %1006 = vst.msk [vmem:[%s1602_s24 + $0x10] sm:$0xff] %vm424_vm0, %v998_v48  ;;  %v958_v54 = vadd.f32 %v929_v50, %v724_v42  ;;  %v727_v61 = vadd.f32 %v708_v52, %v591_v53  ;;  %v1023_v8 = vsel %vm424_vm0, %v998_v48, 0.0  ;;  %v1047_v33 = vmul.f32 %v998_v48, %v998_v48 }
  0xfd   : > { %v996_v55 = vsel %vm980_vm6, %v972_v44, %v988_v49  ;;  %vm983_vm7 = vcmp.ge.f32.partialorder %v975_v51, 0.0  ;;  %v991_v56 = vmul.f32 0.01, %v975_v51  ;;  %v1340_v58 = vpop.f32.mrf.mxu0 }
  0xfe   : > { %1004 = vst.msk [vmem:[%s1602_s24] sm:$0xff] %vm424_vm0, %v996_v55  ;;  %v973_v60 = vadd.f32 %v1595_v31, %v958_v54  ;;  %v1045_v62 = vmul.f32 %v996_v55, %v996_v55  ;;  %v1349_v0 = vpop.f32.mrf.mxu1  ;;  %v730_v1 = vadd.f32 %v1340_v58, %v602_v59  ;;  %v1020_v9 = vsel %vm424_vm0, %v996_v55, 0.0 }
  0xff   : > { %v999_v63 = vsel %vm983_vm7, %v975_v51, %v991_v56  ;;  %v711_v3 = vpop.f32.mrf.mxu0  ;;  %v963_v7 = vadd.f32 %v1349_v0, %v729_v57  ;;  %v1056_v32 = vsel %vm424_vm0, %v1047_v33, 0.0  ;;  %v1019_v33 = vld [vmem:[%s1580_s11] sm:$0x1] }
 0x100   : > { %1007 = vst.msk [vmem:[%s1602_s24 + $0x18] sm:$0xff] %vm424_vm0, %v999_v63  ;;  %vm981_vm8 = vcmp.ge.f32.partialorder %v973_v60, 0.0  ;;  %v989_v5 = vmul.f32 0.01, %v973_v60  ;;  %v942_v6 = vpop.f32.mrf.mxu1  ;;  %v1053_v11 = vsel %vm424_vm0, %v1045_v62, 0.0  ;;  %v728_v15 = vadd.f32 %v711_v3, %v594_v4 }
 0x101   : > { %v961_v10 = vadd.f32 %v942_v6, %v727_v61  ;;  %v978_v13 = vadd.f32 %v1595_v31, %v963_v7  ;;  %v1048_v20 = vmul.f32 %v999_v63, %v999_v63  ;;  %v1025_v34 = vsel %vm424_vm0, %v999_v63, 0.0 }
 0x102   : > { %v997_v12 = vsel %vm981_vm8, %v973_v60, %v989_v5  ;;  %v1350_v14 = vpop.f32.mrf.mxu1 }
 0x103   : > { %1005 = vst.msk [vmem:[%s1602_s24 + $0x8] sm:$0xff] %vm424_vm0, %v997_v12  ;;  %v1021_v16 = vsel %vm424_vm0, %v997_v12, 0.0  ;;  %v1046_v17 = vmul.f32 %v997_v12, %v997_v12  ;;  %v976_v18 = vadd.f32 %v1595_v31, %v961_v10  ;;  %v964_v19 = vadd.f32 %v1350_v14, %v730_v1 }
 0x104   : > { %v1022_v21 = vadd.f32 %v1021_v16, %v1020_v9  ;;  %vm986_vm9 = vcmp.ge.f32.partialorder %v978_v13, 0.0  ;;  %v994_v22 = vmul.f32 0.01, %v978_v13  ;;  %v945_v25 = vpop.f32.mrf.mxu1  ;;  %v1058_v38 = vsel %vm424_vm0, %v1048_v20, 0.0 }
 0x105   : > { %v1054_v23 = vsel %vm424_vm0, %v1046_v17, 0.0  ;;  %vm984_vm10 = vcmp.ge.f32.partialorder %v976_v18, 0.0  ;;  %v992_v24 = vmul.f32 0.01, %v976_v18  ;;  %v979_v26 = vadd.f32 %v1595_v31, %v964_v19 }
 0x106   : > { %v1024_v27 = vadd.f32 %v1023_v8, %v1022_v21  ;;  %v1055_v28 = vadd.f32 %v1054_v23, %v1053_v11  ;;  %v1002_v29 = vsel %vm986_vm9, %v978_v13, %v994_v22  ;;  %v962_v30 = vadd.f32 %v945_v25, %v728_v15  ;;  %v1044_v11 = vld [vmem:[%s1586_s14] sm:$0x1] }
 0x107   : > { %1010 = vst.msk [vmem:[%s1602_s24 + $0x30] sm:$0xff] %vm424_vm0, %v1002_v29  ;;  %v1000_v2 = vsel %vm984_vm10, %v976_v18, %v992_v24  ;;  %vm987_vm11 = vcmp.ge.f32.partialorder %v979_v26, 0.0  ;;  %v995_v39 = vmul.f32 0.01, %v979_v26  ;;  %v1051_v49 = vmul.f32 %v1002_v29, %v1002_v29 }
 0x108   : > { %v1057_v35 = vadd.f32 %v1056_v32, %v1055_v28  ;;  %1008 = vst.msk [vmem:[%s1602_s24 + $0x20] sm:$0xff] %vm424_vm0, %v1000_v2  ;;  %v1026_v36 = vadd.f32 %v1025_v34, %v1024_v27  ;;  %v1049_v37 = vmul.f32 %v1000_v2, %v1000_v2  ;;  %v977_v40 = vadd.f32 %v1595_v31, %v962_v30 }
 0x109   : > { %v1027_v41 = vsel %vm424_vm0, %v1000_v2, 0.0  ;;  %v1003_v44 = vsel %vm987_vm11, %v979_v26, %v995_v39  ;;  %v1031_v52 = vsel %vm424_vm0, %v1002_v29, 0.0  ;;  %v1064_v57 = vsel %vm424_vm0, %v1051_v49, 0.0 }
 0x10a   : > { %v1059_v42 = vadd.f32 %v1058_v38, %v1057_v35  ;;  %v1028_v43 = vadd.f32 %v1027_v41, %v1026_v36  ;;  %vm985_vm12 = vcmp.ge.f32.partialorder %v977_v40, 0.0  ;;  %v993_v45 = vmul.f32 0.01, %v977_v40  ;;  %1011 = vst.msk [vmem:[%s1602_s24 + $0x38] sm:$0xff] %vm424_vm0, %v1003_v44 }
 0x10b   : > { %v1060_v46 = vsel %vm424_vm0, %v1049_v37, 0.0  ;;  %v1052_v53 = vmul.f32 %v1003_v44, %v1003_v44  ;;  %v1033_v58 = vsel %vm424_vm0, %v1003_v44, 0.0 }
 0x10c   : > { %v1061_v47 = vadd.f32 %v1060_v46, %v1059_v42  ;;  %v1001_v48 = vsel %vm985_vm12, %v977_v40, %v993_v45 }
 0x10d   : > { %1009 = vst.msk [vmem:[%s1602_s24 + $0x28] sm:$0xff] %vm424_vm0, %v1001_v48  ;;  %v1029_v50 = vsel %vm424_vm0, %v1001_v48, 0.0  ;;  %v1050_v51 = vmul.f32 %v1001_v48, %v1001_v48  ;;  %v1066_v61 = vsel %vm424_vm0, %v1052_v53, 0.0 }
 0x10e   : > { %v1030_v31 = vadd.f32 %v1029_v50, %v1028_v43 }
 0x10f   : > { %v1062_v54 = vsel %vm424_vm0, %v1050_v51, 0.0 }
 0x110   : > { %v1032_v55 = vadd.f32 %v1031_v52, %v1030_v31  ;;  %v1063_v56 = vadd.f32 %v1062_v54, %v1061_v47 }
 0x112   : > { %v1034_v59 = vadd.f32 %v1033_v58, %v1032_v55  ;;  %v1065_v60 = vadd.f32 %v1064_v57, %v1063_v56 }
 0x114   : > { %v1035_v62 = vrot.slane %v1034_v59, 4  ;;  %v1067_v63 = vadd.f32 %v1066_v61, %v1065_v60 }
 0x116   : > { %v1036_v0 = vadd.f32 %v1035_v62, %v1034_v59  ;;  %v1068_v1 = vrot.slane %v1067_v63, 4 }
 0x118   : > { %v1037_v3 = vrot.slane %v1036_v0, 2  ;;  %v1069_v4 = vadd.f32 %v1068_v1, %v1067_v63 }
 0x11a   : > { %v1038_v5 = vadd.f32 %v1037_v3, %v1036_v0  ;;  %v1070_v6 = vrot.slane %v1069_v4, 2 }
 0x11c   : > { %v1039_v7 = vrot.slane %v1038_v5, 1  ;;  %v1071_v8 = vadd.f32 %v1070_v6, %v1069_v4 }
 0x11e   : > { %v1040_v9 = vadd.f32 %v1039_v7, %v1038_v5  ;;  %v1072_v10 = vrot.slane %v1071_v8, 1 }
 0x120   : > { %v1041_v12 = vadd.f32 %v1040_v9, %v1019_v33  ;;  %v1073_v13 = vadd.f32 %v1072_v10, %v1071_v8 }
 0x122   : > { %1043 = vst.msk [vmem:[%s1580_s11] sm:$0x1] %vm1016_vm4, %v1041_v12  ;;  %v1074_v14 = vadd.f32 %v1073_v13, %v1044_v11 }
 0x124   : > { %1075 = vst.msk [vmem:[%s1586_s14] sm:$0x1] %vm1016_vm4, %v1074_v14 }
 0x125 PF: > { %s16_s20 = sadd.s32 1, %s1411_s20   ;;  %s1666_s18 = smov %s1407_s19 }
 0x126   : > { %p13_p5 = scmp.ge.s32.totalorder %s16_s20, 4   ;;  %s1667_s19 = smov %s1669_s21 }
 0x128   :  { %15 = sbr.rel (!%p13_p5) target bundleno = 2 (0x2), region = 95 }

</bundles_post_ra>
